<compile_context>
chip_gen: v7x
topology: tpu7x:2x2x1
jax: 0.10.0
libtpu: 0.0.40
codegen_flags: <defaults>
</compile_context>

<pallas_src>
import functools
import math

import jax
import jax.numpy as jnp
from jax.experimental import pallas as pl
from jax.experimental.pallas import tpu as pltpu


def _round_up(x, m):
    return (x + m - 1) // m * m


# ---------------- fused Pallas kernel ----------------
def _modulation_kernel(x_ref, g_ref, fw_ref, o_ref, *, inv_tau, half_scale):
    # Upcast per-tile (cheap VPU op hidden under the transcendental-bound compute).
    x = x_ref[...].astype(jnp.float32)                     # (tm, K)

    # sigmoid(x) * (modulation_order - 1), using one tanh EUP push instead of exp + divide.
    logits = half_scale * (jnp.tanh(0.5 * x) + 1.0)

    # Soft Gumbel-Softmax (hard=False), numerically stable, f32 throughout.
    z = (logits + g_ref[...]) * inv_tau
    z = z - jnp.max(z, axis=-1, keepdims=True)
    p = jnp.exp(z)
    inv_denom = 1.0 / jnp.sum(p, axis=-1, keepdims=True)   # (tm, 1): exact, cheap
    y = p * inv_denom

    # Single fused matmul: y @ (constellation @ W^T)  ->  (tm, F). Stays on-chip.
    o_ref[...] = jnp.dot(y, fw_ref[...], preferred_element_type=jnp.float32)


# ---------------- wrapper ----------------
def modulation_forward(x, constellation, proj_wt, *, tau, noise_key, tile_m=1024):
    """x: [B, S, K] with K == modulation_order; constellation: [K, 2]; proj_wt: [2, F] (= W.T)."""
    B, S, K = x.shape
    assert constellation.shape == (K, 2), constellation.shape
    F = proj_wt.shape[1]
    M = B * S

    x2d = x.reshape(M, K)                                  # view; upcast happens in-kernel
    # Standard Gumbel(0,1) noise, sampled once (portable across real-TPU and interpret runs).
    g = jax.random.gumbel(noise_key, (M, K), jnp.float32)
    # Algebraic fusion of the two tiny matmuls: [K,2] @ [2,F] -> [K,F], computed once.
    fused_w = jnp.dot(constellation.astype(jnp.float32), proj_wt.astype(jnp.float32))

    # Tile rows: multiple of 8 (sublane), large enough to amortize per-step overhead,
    # but capped so the grid keeps >=2 "parallel" steps (both v7x TensorCores busy).
    tm = max(8, min(int(tile_m), _round_up(pl.cdiv(M, 2), 8)))
    grid = (pl.cdiv(M, tm),)                               # ragged last block handled by Pallas

    kernel = functools.partial(_modulation_kernel,
                               inv_tau=1.0 / float(tau),
                               half_scale=0.5 * float(K - 1))

    out = pl.pallas_call(
        kernel,
        out_shape=jax.ShapeDtypeStruct((M, F), jnp.float32),
        grid_spec=pltpu.PrefetchScalarGridSpec(
            num_scalar_prefetch=0,
            grid=grid,
            in_specs=[
                pl.BlockSpec((tm, K), lambda i: (i, 0)),   # activations: tiled over M
                pl.BlockSpec((tm, K), lambda i: (i, 0)),   # gumbel noise: tiled over M
                pl.BlockSpec((K, F), lambda i: (0, 0)),    # fused weight: VMEM-resident
            ],
            out_specs=pl.BlockSpec((tm, F), lambda i: (i, 0)),
        ),
        compiler_params=pltpu.CompilerParams(dimension_semantics=("parallel",)),
    )(x2d, g, fused_w)

    return out.reshape(B, S, F)


# ---------------- deterministic parameter init (matches nn.Module defaults) ----------------
def init_params(key, modulation_order=65, feature_dim=64):
    kc, kp = jax.random.split(key)
    constellation = jax.random.normal(kc, (modulation_order, 2), jnp.float32) / math.sqrt(2.0)
    bound = 1.0 / math.sqrt(2.0)                            # nn.Linear(2, F): U(-1/sqrt(fan_in), +)
    proj_w = jax.random.uniform(kp, (feature_dim, 2), jnp.float32, -bound, bound)
    return dict(constellation=constellation, proj_wt=proj_w.T)   # store W^T: [2, F]
    # TODO(synk): update_tau() is host-side training state (temperature schedule); it does not
    # affect a single forward pass, so it is handled by passing `tau` into modulation_forward.


# ---------------- demo ----------------
if __name__ == "__main__":
    key = jax.random.PRNGKey(0)
    pkey, xkey, nkey = jax.random.split(key, 3)

    MOD_ORDER, FEATURE_DIM = 65, 64
    B, S = 2, 8                                             # input last dim must equal MOD_ORDER
    params = init_params(pkey, MOD_ORDER, FEATURE_DIM)
    x = jax.random.normal(xkey, (B, S, MOD_ORDER), jnp.float32)

    # tile_m=8 at this tiny demo size -> grid of 2 parallel steps (exercises a multi-step grid);
    # at realistic sizes the default tile_m=1024 is used.
    out = modulation_forward(x, params["constellation"], params["proj_wt"],
                             tau=1.0, noise_key=nkey, tile_m=8)
    out = jax.block_until_ready(out)

    assert out.shape == (B, S, FEATURE_DIM), out.shape
    assert out.dtype == jnp.float32
    assert bool(jnp.all(jnp.isfinite(out)))
    print("KERNEL_OK")
</pallas_src>

<mosaic_0001>
module attributes {stable_mosaic.version = 11 : i64} {
  func.func @_modulation_kernel(%arg0: i32, %arg1: memref<8x65xf32, #tpu.memory_space<vmem>>, %arg2: memref<8x65xf32, #tpu.memory_space<vmem>>, %arg3: memref<65x64xf32, #tpu.memory_space<vmem>>, %arg4: memref<8x64xf32, #tpu.memory_space<vmem>>) attributes {dimension_semantics = [#tpu.dimension_semantics<parallel>], iteration_bounds = array<i64: 2>, scalar_prefetch = 0 : i64, scratch_operands = 0 : i64, tpu.core_type = #tpu.core_type<tc>, window_params = [{transform_indices = @transform_0, window_bounds = array<i64: 8, 65>}, {transform_indices = @transform_1, window_bounds = array<i64: 8, 65>}, {pipeline_mode = #tpu.pipeline_mode<synchronous>, transform_indices = @transform_2, window_bounds = array<i64: 65, 64>}, {transform_indices = @transform_3, window_bounds = array<i64: 8, 64>}]} {
    %c0 = arith.constant 0 : index
    %c0_0 = arith.constant 0 : index
    %0 = vector.load %arg1[%c0, %c0_0] : memref<8x65xf32, #tpu.memory_space<vmem>>, vector<8x65xf32>
    %cst = arith.constant 5.000000e-01 : f32
    %1 = vector.broadcast %cst : f32 to vector<8x65xf32>
    %2 = arith.mulf %1, %0 : vector<8x65xf32>
    %3 = math.tanh %2 : vector<8x65xf32>
    %cst_1 = arith.constant 1.000000e+00 : f32
    %4 = vector.broadcast %cst_1 : f32 to vector<8x65xf32>
    %5 = arith.addf %3, %4 : vector<8x65xf32>
    %cst_2 = arith.constant 3.200000e+01 : f32
    %6 = vector.broadcast %cst_2 : f32 to vector<8x65xf32>
    %7 = arith.mulf %6, %5 : vector<8x65xf32>
    %c0_3 = arith.constant 0 : index
    %c0_4 = arith.constant 0 : index
    %8 = vector.load %arg2[%c0_3, %c0_4] : memref<8x65xf32, #tpu.memory_space<vmem>>, vector<8x65xf32>
    %9 = arith.addf %7, %8 : vector<8x65xf32>
    %cst_5 = arith.constant 1.000000e+00 : f32
    %10 = vector.broadcast %cst_5 : f32 to vector<8x65xf32>
    %11 = arith.mulf %9, %10 : vector<8x65xf32>
    %cst_6 = arith.constant dense<0xFF800000> : vector<8xf32>
    %12 = vector.multi_reduction <maximumf>, %11, %cst_6 [1] : vector<8x65xf32> to vector<8xf32>
    %13 = vector.shape_cast %12 : vector<8xf32> to vector<8x1xf32>
    %14 = vector.broadcast %13 : vector<8x1xf32> to vector<8x65xf32>
    %15 = arith.subf %11, %14 : vector<8x65xf32>
    %16 = math.exp %15 : vector<8x65xf32>
    %cst_7 = arith.constant dense<0.000000e+00> : vector<8xf32>
    %17 = vector.multi_reduction <add>, %16, %cst_7 [1] : vector<8x65xf32> to vector<8xf32>
    %18 = vector.shape_cast %17 : vector<8xf32> to vector<8x1xf32>
    %cst_8 = arith.constant 1.000000e+00 : f32
    %19 = vector.broadcast %cst_8 : f32 to vector<8x1xf32>
    %20 = arith.divf %19, %18 : vector<8x1xf32>
    %21 = vector.broadcast %20 : vector<8x1xf32> to vector<8x65xf32>
    %22 = arith.mulf %16, %21 : vector<8x65xf32>
    %c0_9 = arith.constant 0 : index
    %c0_10 = arith.constant 0 : index
    %23 = vector.load %arg3[%c0_9, %c0_10] : memref<65x64xf32, #tpu.memory_space<vmem>>, vector<65x64xf32>
    %cst_11 = arith.constant dense<0.000000e+00> : vector<8x64xf32>
    %24 = tpu.matmul %22, %23, %cst_11 {dimension_numbers = #tpu.dot_dimension_numbers<[1], [0], [0], [1], [0, 0, 1, 1], [], []>} : vector<8x65xf32>, vector<65x64xf32>, vector<8x64xf32> -> vector<8x64xf32>
    %c0_12 = arith.constant 0 : index
    %c0_13 = arith.constant 0 : index
    %25 = vector.load %arg4[%c0_12, %c0_13] : memref<8x64xf32, #tpu.memory_space<vmem>>, vector<8x64xf32>
    tpu.vector_store %arg4[%c0_12, %c0_13], %24 {strides = array<i32>} : memref<8x64xf32, #tpu.memory_space<vmem>>, vector<8x64xf32>,
    return
  }
  func.func @transform_0(%arg0: i32) -> (i32, i32) {
    %c0_i32 = arith.constant 0 : i32
    %c0_i32_0 = arith.constant 0 : i32
    return %arg0, %c0_i32 : i32, i32
  }
  func.func @transform_1(%arg0: i32) -> (i32, i32) {
    %c0_i32 = arith.constant 0 : i32
    %c0_i32_0 = arith.constant 0 : i32
    return %arg0, %c0_i32 : i32, i32
  }
  func.func @transform_2(%arg0: i32) -> (i32, i32) {
    %c0_i32 = arith.constant 0 : i32
    %c0_i32_0 = arith.constant 0 : i32
    %c0_i32_1 = arith.constant 0 : i32
    return %c0_i32, %c0_i32_0 : i32, i32
  }
  func.func @transform_3(%arg0: i32) -> (i32, i32) {
    %c0_i32 = arith.constant 0 : i32
    %c0_i32_0 = arith.constant 0 : i32
    return %arg0, %c0_i32 : i32, i32
  }
}

</mosaic_0001>

<bundles_post_ra>
// kernel: tpu_custom_call.1
= control target key start
LH: loop header
LB: loop body
LE: loop exit
PB: predicated region body
PF: predicated region fallthrough
CT: control target
= control target key end

     0   :  { %8 = vsyncpa [#allocation3], 0  ;;  %s701_s0 = inlined_call_operand.vmem [shape: f32[16,65], index: 0, kind: input, shape index: {}]   ;;  %s702_s1 = inlined_call_operand.vmem [shape: f32[16,65], index: 1, kind: input, shape index: {}]   ;;  %s703_s2 = inlined_call_operand.vmem [shape: f32[65,64], index: 2, kind: input, shape index: {}]   ;;  %s704_s3 = inlined_call_operand.hbm [shape: f32[16,64], index: 3, kind: output, shape index: {}]  }
   0x1   :  { %10 = vsyncpa [#allocation3 + $0x1], 0  ;;  %s568_s12 = smov 0   ;;  %s570_s13 = smov 0  }
   0x2   :  { %s572_s14 = smov 0   ;;  %s574_s15 = smov 0  }
   0x3 LB: > { %s589_s16 = sadd.s32 4294967295, %s542_s15   ;;  %s376_s17 = sadd.s32 4294967294, %s542_s15   ;;  %s542_s15 = sphi %s574_s15, %s710_s15   ;;  %s538_s14 = sphi %s572_s14, %s709_s14   ;;  %s534_s13 = sphi %s570_s13, %s708_s13   ;;  %s530_s12 = sphi %s568_s12, %s707_s12  }
   0x4   : > { %s593_s18 = sadd.s32 1, %s542_s15   ;;  %s96_s19 = sadd.s32 1, %s538_s14 }
   0x5   : > { %s93_s20 = ssub.s32 %s542_s15, %s593_s18  ;;  %p106_p0 = scmp.ne.s32.totalorder %s538_s14, %s534_s13 }
   0x6   : > { %p94_p1 = scmp.eq.s32.totalorder %s93_s20, 0  ;;  %p107_p2 = scmp.eq.s32.totalorder %s589_s16, 1 }
   0x7   : > { %p112_p3 = scmp.ne.s32.totalorder %s534_s13, %s530_s12  ;;  %p113_p4 = scmp.eq.s32.totalorder %s376_s17, 1 }
   0x8   : > { %s604_s21 = scalar_select %p94_p1, %s538_s14, %s96_s19  }
   0x9   : > { %p606_p5 = por %p107_p2, %p106_p0  ;;  %p610_p6 = por %p113_p4, %p112_p3 }
   0xa   : > { %p379_p7 = scmp.ge.s32.totalorder %s542_s15, 1  ;;  %p148_p8 = scmp.lt.s32.totalorder %s542_s15, 3 }
   0xc   : > { %p149_p9 = pnand %p379_p7, %p148_p8 }
   0xd   : > { %p175_p10 = scmp.lt.s32.totalorder (!%p149_p9), %s589_s16, 1  ;;  %vm190_vm0 = vcmask (!%p149_p9), 531456   ;;  %v203_v8 = vld [vmem:[%s703_s2] sm:$0xff] (!%p149_p9)  ;;  %v204_v9 = vld [vmem:[%s703_s2 + $0x8] sm:$0xff] (!%p149_p9)  ;;  %v544_v10 = vmov (!%p149_p9), 0.0|0.0   ;;  %v205_v17 = vld [vmem:[%s703_s2 + $0x10] sm:$0xff] (!%p149_p9) }
   0xe   : > { %152 = sbr.rel (%p149_p9) target bundleno = 585 (0x249), region = 32  ;;  %420 = vmatprep.subr.bf16.mxu0 (!%p149_p9), %v544_v10  ;;  %v421_v11 = vpack.c.bf16 (!%p149_p9), %v204_v9, %v203_v8  ;;  %v206_v18 = vld [vmem:[%s703_s2 + $0x18] sm:$0xff] (!%p149_p9)  ;;  %v207_v20 = vld [vmem:[%s703_s2 + $0x20] sm:$0xff] (!%p149_p9)  ;;  %v208_v21 = vld [vmem:[%s703_s2 + $0x28] sm:$0xff] (!%p149_p9)  ;;  %vm545_vm1 = vmmov (!%p149_p9), 0   ;;  %v546_v25 = vmov (!%p149_p9), 0.0  }
   0xf   : > { %v424_v19 = vpack.c.bf16 (!%p149_p9), %v206_v18, %v205_v17  ;;  %v427_v22 = vpack.c.bf16 (!%p149_p9), %v208_v21, %v207_v20  ;;  %v209_v23 = vld [vmem:[%s703_s2 + $0x30] sm:$0xff] (!%p149_p9)  ;;  %v210_v24 = vld [vmem:[%s703_s2 + $0x38] sm:$0xff] (!%p149_p9)  ;;  %417 = vmatprep.mubr.msk.f32.mxu0 (!%p149_p9), %vm545_vm1, %v546_v25  ;;  %v211_v27 = vld [vmem:[%s703_s2 + $0x40] sm:$0x1] (!%p149_p9)  ;;  %vm215_vm2 = vcmask (!%p149_p9), 1040384   ;;  %s172_s5 = sand.u32 (!%p149_p9), 1, %s534_s13  }
  0x10   : > { %422 = vmatpush3.bf16.msra.mxu0 (!%p149_p9), %v421_v11  ;;  %v430_v26 = vpack.c.bf16 (!%p149_p9), %v210_v24, %v209_v23  ;;  %s380_s6 = sshll.u32 (!%p149_p9), %s172_s5, 3  ;;  %s386_s7 = sshll.u32 (!%p149_p9), %s589_s16, 7  ;;  %vm289_vm3 = vcmask (!%p149_p9), 523264  }
  0x11   : > { %423 = vmatprep.subr.bf16.mxu0 (!%p149_p9), %v544_v10  ;;  %s174_s8 = scalar_lea.vmem (!%p149_p9), [#allocation2], %s380_s6  ;;  %s659_s17 = scalar_lea.hbm (!%p149_p9), %s704_s3, %s386_s7 }
  0x12   : > { %s305_s9 = sshll.u32 (!%p149_p9), %s174_s8, 4  ;;  %s292_s19 = scalar_lea.sflag (!%p149_p9), [#allocation3], %s172_s5  ;;  %s661_s9 = int_to_ptr.vmem [resolvable:$true] %s305_s9 }
  0x13   : > { %s480_s20 = scalar_lea.vmem (!%p149_p9), %s661_s9, 128 }
  0x14   : > { %425 = vmatpush3.bf16.msra.mxu0 (!%p149_p9), %v424_v19  ;;  %p481_p11 = scmp.ne.s32.totalorder (!%p149_p9), %s661_s9, %s480_s20 }
  0x15   : > { %s176_s24 = scalar_select %p175_p10, %s589_s16, 1  ;;  %426 = vmatprep.subr.bf16.mxu0 %v544_v10 }
  0x16   : > { %p482_p12 = pnand %p481_p11, %p606_p5  ;;  %s547_s16 = smov [#allocation2]  }
  0x17   : > { %s381_s25 = sshll.u32 %s176_s24, 3  ;;  %s484_s24 = sshll.u32 %s547_s16, 4  ;;  %s485_s24 = int_to_ptr.vmem [resolvable:$false] %s484_s24 }
  0x18   : > { %s178_s28 = scalar_lea.vmem %s701_s0, %s381_s25  ;;  %s182_s4 = scalar_lea.vmem %s702_s1, %s381_s25  ;;  %428 = vmatpush3.bf16.msra.mxu0 %v427_v22 }
  0x19   : > { %v183_v0 = vld [vmem:[%s178_s28] sm:$0xff]  ;;  %429 = vmatprep.subr.bf16.mxu0 %v544_v10  ;;  %p483_p13 = pneg %p482_p12  ;;  %s486_s25 = scalar_lea.vmem %s485_s24, 256 }
  0x1a   : > { %v184_v1 = vmul.f32 0.5, %v183_v0  ;;  %v188_v4 = vld [vmem:[%s182_s4] sm:$0xff]  ;;  %p487_p0 = scmp.lt.s32.totalorder %s661_s9, %s485_s24  ;;  %p488_p1 = scmp.lt.s32.totalorder %s486_s25, %s480_s20 }
  0x1c   : > { %474 = vtanh.f32 %v184_v1  ;;  %431 = vmatpush3.bf16.msra.mxu0 %v430_v26  ;;  %p489_p2 = por %p488_p1, %p487_p0 }
  0x1d   : > { %415 = vmatprep.subr.mxu0 %v546_v25 }
  0x1e   : > { %p490_p3 = pnand %p489_p2, %p483_p13 }
  0x20   : > { %416 = vmatpush3.msk.msra.mxu0 %vm215_vm2, %v211_v27 }
  0x26   : > { %v475_v2 = vpop.eup %474 }
  0x27   : > { %v186_v3 = vadd.f32 1.0, %v475_v2 }
  0x29   : > { %v187_v5 = vmul.f32 32.0, %v186_v3 }
  0x2b   : > { %v189_v6 = vadd.f32 %v188_v4, %v187_v5 }
  0x2d   : > { %v191_v7 = vsel %vm190_vm0, %v189_v6, -inf }
  0x2e   : > { %192 = vmax.xlane.f32.xlu0 %v191_v7 }
  0xbb   : > { %v193_v12 = vpop.xlane.xlu0 %192 }
  0xbc   : > { %v194_v13 = vsub.f32 %v189_v6, %v193_v12 }
  0xbe   : > { %v195_v14 = vmul.f32 1.442695, %v194_v13 }
  0xc0   : > { %476 = vpow2.f32 %v195_v14 }
  0xca   : > { %v477_v15 = vpop.eup %476 }
  0xcb   : > { %v197_v16 = vsel %vm190_vm0, %v477_v15, 0.0 }
  0xcc   : > { %198 = vadd.xlane.f32.xlu0 %v197_v16 }
 0x159   : > { %v199_v28 = vpop.xlane.xlu0 %198 }
 0x15a   : > { %478 = vrcp.f32 %v199_v28 }
 0x164   : > { %v479_v29 = vpop.eup %478 }
 0x165   : > { %v202_v30 = vmul.f32 %v479_v29, %v477_v15 }
 0x167   : > { %418 = vmatmul.mubr.msk.f32.vlgmr.msra.gmra.mrb[0].mxu0 %vm190_vm0, %v202_v30 }
 0x23a   : > { %v285_v31 = vpop.f32.mrb[0].mxu0 }
 0x23b   : > { %290 = vst.msk [vmem:[%s174_s8] sm:$0xff] %vm289_vm3, %v285_v31  ;;  %v419_v32 = vpop.f32.mrb[1].mxu0 }
 0x23c   : > { %493 = shalt.err (!%p490_p3)
}
 0x23d   : > { %s494_s26 = scalar_lea.hbm %s659_s17, 128  ;;  %s498_s29 = scalar_lea.hbm %s704_s3, 256 }
 0x23e   : > { %p495_p4 = scmp.ne.s32.totalorder %s659_s17, %s494_s26  ;;  %p499_p9 = scmp.lt.u32.totalorder %s659_s17, %s704_s3 }
 0x23f   : > { %p500_p10 = scmp.lt.u32.totalorder %s498_s29, %s494_s26  ;;  %p502_p12 = scmp.lt.u32.totalorder %s494_s26, %s659_s17 }
 0x240   : > { %p496_p7 = pnand %p495_p4, %p606_p5 }
 0x241   : > { %p501_p11 = por %p500_p10, %p499_p9 }
 0x242   : > { %p497_p8 = pneg %p496_p7 }
 0x243   : > { %p503_p13 = por %p502_p12, %p501_p11 }
 0x245   : > { %p504_p0 = pnand %p503_p13, %p497_p8 }
 0x247   : > { %507 = shalt.err (!%p504_p0)
}
 0x248   : > { %432 = dma.vmem_to_hbm [thread:$0]  (%p606_p5), %s661_s9, 128, %s659_s17, %s292_s19  }
 0x249 PF: > { %p438_p1 = scmp.ge.s32.totalorder %s542_s15, 2  ;;  %s317_s5 = sand.u32 1, %s530_s12  }
 0x24a   : > { %s318_s6 = scalar_lea.sflag [#allocation3], %s317_s5 }
 0x24b   : > { %p435_p2 = pnand %p438_p1, %p610_p6 }
 0x24d   : > { %525 = dma.done.wait (!%p435_p2), %s318_s6, 128  }
 0x24e   : > { %527 = vsyncadd (!%p435_p2), %s318_s6, 4294967168  ;;  %p13_p3 = scmp.ge.s32.totalorder %s593_s18, 4   ;;  %s707_s12 = smov %s534_s13 }
 0x24f   : > { %s708_s13 = smov %s538_s14  ;;  %s709_s14 = smov %s604_s21 }
 0x250   : > { %s710_s15 = smov %s593_s18  ;;  %15 = sbr.rel (!%p13_p3) target bundleno = 3 (0x3), region = 70 }
 0x257   :  { %323 = vsyncpa [#allocation3], 1 }
 0x258   :  { %325 = vsyncpa [#allocation3 + $0x1], 1 }

</bundles_post_ra>
